<compile_context>
chip_gen: v7x
topology: tpu7x:2x2x1
jax: 0.10.0
libtpu: 0.0.40
codegen_flags: <defaults>
</compile_context>

<pallas_src>
import functools

import jax
import jax.numpy as jnp
from jax import lax
from jax.experimental import pallas as pl
from jax.experimental.pallas import tpu as pltpu


def _round_up(x, m):
    return ((x + m - 1) // m) * m


def _cdiv(a, b):
    return -(-a // b)


def quaternion_kernel(x_ref, o_ref, *, ts, cs):
    # x_ref: (4, ts, 128)   o_ref: (9, ts, 128)   ts % cs == 0
    dt = o_ref.dtype

    def body(j, carry):
        base = pl.multiple_of(j * cs, cs)
        sl = pl.ds(base, cs)

        # Per-chunk loads: four (cs, 128) slabs of full vregs.
        x0 = x_ref[0, sl, :]
        x1 = x_ref[1, sl, :]
        x2 = x_ref[2, sl, :]
        x3 = x_ref[3, sl, :]

        s00 = x0 * x0
        s11 = x1 * x1
        s22 = x2 * x2
        s33 = x3 * x3
        # Fused normalization: r_i * r_j = x_i * x_j / (1e-5 + ss),
        # every entry carries a factor of 2  ->  s = 2 / (1e-5 + ss).
        s = 2.0 / (1e-5 + (s00 + s11 + s22 + s33))

        x01 = x0 * x1
        x23 = x2 * x3
        x02 = x0 * x2
        x13 = x1 * x3
        x12 = x1 * x2
        x03 = x0 * x3

        o_ref[0, sl, :] = (1.0 - s * (s11 + s22)).astype(dt)   # R00
        o_ref[1, sl, :] = (s * (x01 - x23)).astype(dt)          # R01
        o_ref[2, sl, :] = (s * (x02 + x13)).astype(dt)          # R02
        o_ref[3, sl, :] = (s * (x01 + x23)).astype(dt)          # R10
        o_ref[4, sl, :] = (1.0 - s * (s00 + s22)).astype(dt)   # R11
        o_ref[5, sl, :] = (s * (x12 - x03)).astype(dt)          # R12
        o_ref[6, sl, :] = (s * (x02 - x13)).astype(dt)          # R20
        o_ref[7, sl, :] = (s * (x03 + x12)).astype(dt)          # R21
        o_ref[8, sl, :] = (1.0 - s * (s00 + s11)).astype(dt)   # R22
        return carry

    lax.fori_loop(0, ts // cs, body, 0)


@functools.partial(jax.jit, static_argnames=("ts",))
def quaternion_pallas_native(x_t, *, ts=1024):
    """Lane-dense path: x_t is (4, B) -> returns (9, B).

    `ts` is the per-step sublane tile (rows of 128 lanes); multiple of 8.
    Default 1024 fits all chips; raise to 2048-4096 on v7x for fewer steps.
    """
    B = x_t.shape[1]

    # --- tile sizing: last tile nearly full, no round-up-to-TB waste -------
    nrows = max(1, _cdiv(B, 128))            # 128-lane rows needed
    ts_req = max(8, (ts // 8) * 8)           # requested tile (mult of 8)
    n_steps = max(1, _cdiv(nrows, ts_req))
    TS = _round_up(_cdiv(nrows, n_steps), 8)  # actual tile, <= ts_req
    nrows_p = n_steps * TS
    Bp = nrows_p * 128

    if Bp != B:
        x_t = jnp.pad(x_t, ((0, 0), (0, Bp - B)))   # zeros -> finite outputs
    x3d = x_t.reshape(4, nrows_p, 128)               # free relayout

    # Chunk size inside the kernel (vreg-pressure control).
    cs = 16 if TS % 16 == 0 else 8

    itemsize = jnp.dtype(x_t.dtype).itemsize
    # double-buffered in+out footprint + headroom
    vmem_bytes = 2 * (4 + 9) * TS * 128 * itemsize + (4 << 20)
    vmem_bytes = max(vmem_bytes, 16 << 20)

    kernel = functools.partial(quaternion_kernel, ts=TS, cs=cs)
    out3d = pl.pallas_call(
        kernel,
        out_shape=jax.ShapeDtypeStruct((9, nrows_p, 128), x_t.dtype),
        grid=(n_steps,),
        in_specs=[pl.BlockSpec((4, TS, 128), lambda i: (0, i, 0))],
        out_specs=pl.BlockSpec((9, TS, 128), lambda i: (0, i, 0)),
        compiler_params=pltpu.CompilerParams(
            dimension_semantics=("parallel",),
            vmem_limit_bytes=int(vmem_bytes),
        ),
    )(x3d)

    return out3d.reshape(9, Bp)[:, :B]


def quaternion_pallas(rvec, *, ts=1024):
    """PyTorch-compatible API: rvec (B, 4) float -> (B, 3, 3).

    NOTE: the rvec.T and out_t.T.reshape below are XLA relayouts kept only
    for API parity; prefer `quaternion_pallas_native` when the caller can
    produce/consume the lane-dense (4, B)/(9, B) layout directly.
    """
    B = rvec.shape[0]
    out_t = quaternion_pallas_native(rvec.T, ts=ts)   # (9, B)
    return out_t.T.reshape(B, 3, 3)


def quaternion_ref(rvec):
    """Pure-JAX reference mirroring the PyTorch code."""
    theta = jnp.sqrt(1e-5 + jnp.sum(rvec ** 2, axis=1))
    r = rvec / theta[:, None]
    r0, r1, r2, r3 = r[:, 0], r[:, 1], r[:, 2], r[:, 3]
    out = jnp.stack(
        (
            1.0 - 2.0 * r1 ** 2 - 2.0 * r2 ** 2,
            2.0 * (r0 * r1 - r2 * r3),
            2.0 * (r0 * r2 + r1 * r3),
            2.0 * (r0 * r1 + r2 * r3),
            1.0 - 2.0 * r0 ** 2 - 2.0 * r2 ** 2,
            2.0 * (r1 * r2 - r0 * r3),
            2.0 * (r0 * r2 - r1 * r3),
            2.0 * (r0 * r3 + r1 * r2),
            1.0 - 2.0 * r0 ** 2 - 2.0 * r1 ** 2,
        ),
        axis=1,
    )
    return out.reshape(-1, 3, 3)


def quaternion(rvec, *, ts=1024, small_batch_threshold=4096):
    """Dispatcher: for tiny batches the fused XLA path beats a kernel launch."""
    if rvec.shape[0] < small_batch_threshold:
        return quaternion_ref(rvec)
    return quaternion_pallas(rvec, ts=ts)


if __name__ == "__main__":
    key = jax.random.PRNGKey(0)

    # 1) Small primary check (single grid step, cs=8 path).
    B = 8
    rvec = jax.random.normal(key, (B, 4), dtype=jnp.float32)
    out = jax.block_until_ready(quaternion_pallas(rvec))
    ref = quaternion_ref(rvec)
    assert out.shape == (B, 3, 3), out.shape
    assert jnp.allclose(out, ref, atol=1e-5, rtol=1e-5), "mismatch (B=8)"

    # 2) Batch not a multiple of 128 lanes (padding / slicing path).
    B2 = 300
    rvec2 = jax.random.normal(jax.random.PRNGKey(1), (B2, 4), dtype=jnp.float32)
    out2 = jax.block_until_ready(quaternion_pallas(rvec2))
    ref2 = quaternion_ref(rvec2)
    assert out2.shape == (B2, 3, 3), out2.shape
    assert jnp.allclose(out2, ref2, atol=1e-5, rtol=1e-5), "mismatch (B=300)"

    # 3) Multi-step grid + cs=16 chunked path (small ts to force grid > 1).
    B3 = 2500
    rvec3 = jax.random.normal(jax.random.PRNGKey(2), (B3, 4), dtype=jnp.float32)
    out3 = jax.block_until_ready(quaternion_pallas(rvec3, ts=16))
    ref3 = quaternion_ref(rvec3)
    assert out3.shape == (B3, 3, 3), out3.shape
    assert jnp.allclose(out3, ref3, atol=1e-5, rtol=1e-5), "mismatch (B=2500)"

    print("KERNEL_OK")
</pallas_src>

<mosaic_0001>
module attributes {stable_mosaic.version = 11 : i64} {
  func.func @quaternion_kernel(%arg0: i32, %arg1: memref<4x8x128xf32, #tpu.memory_space<vmem>>, %arg2: memref<9x8x128xf32, #tpu.memory_space<vmem>>) attributes {dimension_semantics = [#tpu.dimension_semantics<parallel>], iteration_bounds = array<i64: 1>, scalar_prefetch = 0 : i64, scratch_operands = 0 : i64, tpu.core_type = #tpu.core_type<tc>, window_params = [{transform_indices = @transform_0, window_bounds = array<i64: 4, 8, 128>}, {transform_indices = @transform_1, window_bounds = array<i64: 9, 8, 128>}]} {
    %c0_i32 = arith.constant 0 : i32
    %c8_i32 = arith.constant 8 : i32
    %0 = arith.muli %c0_i32, %c8_i32 : i32
    %1 = tpu.assume_multiple %0, 8 : i32
    %c0 = arith.constant 0 : index
    %2 = arith.index_cast %1 : i32 to index
    %c0_0 = arith.constant 0 : index
    %3 = vector.load %arg1[%c0, %2, %c0_0] : memref<4x8x128xf32, #tpu.memory_space<vmem>>, vector<1x8x128xf32>
    %4 = vector.shape_cast %3 : vector<1x8x128xf32> to vector<8x128xf32>
    %c1 = arith.constant 1 : index
    %5 = arith.index_cast %1 : i32 to index
    %c0_1 = arith.constant 0 : index
    %6 = vector.load %arg1[%c1, %5, %c0_1] : memref<4x8x128xf32, #tpu.memory_space<vmem>>, vector<1x8x128xf32>
    %7 = vector.shape_cast %6 : vector<1x8x128xf32> to vector<8x128xf32>
    %c2 = arith.constant 2 : index
    %8 = arith.index_cast %1 : i32 to index
    %c0_2 = arith.constant 0 : index
    %9 = vector.load %arg1[%c2, %8, %c0_2] : memref<4x8x128xf32, #tpu.memory_space<vmem>>, vector<1x8x128xf32>
    %10 = vector.shape_cast %9 : vector<1x8x128xf32> to vector<8x128xf32>
    %c3 = arith.constant 3 : index
    %11 = arith.index_cast %1 : i32 to index
    %c0_3 = arith.constant 0 : index
    %12 = vector.load %arg1[%c3, %11, %c0_3] : memref<4x8x128xf32, #tpu.memory_space<vmem>>, vector<1x8x128xf32>
    %13 = vector.shape_cast %12 : vector<1x8x128xf32> to vector<8x128xf32>
    %14 = arith.mulf %4, %4 : vector<8x128xf32>
    %15 = arith.mulf %7, %7 : vector<8x128xf32>
    %16 = arith.mulf %10, %10 : vector<8x128xf32>
    %17 = arith.mulf %13, %13 : vector<8x128xf32>
    %18 = arith.addf %14, %15 : vector<8x128xf32>
    %19 = arith.addf %18, %16 : vector<8x128xf32>
    %20 = arith.addf %19, %17 : vector<8x128xf32>
    %cst = arith.constant 9.99999974E-6 : f32
    %21 = vector.broadcast %cst : f32 to vector<8x128xf32>
    %22 = arith.addf %21, %20 : vector<8x128xf32>
    %cst_4 = arith.constant 2.000000e+00 : f32
    %23 = vector.broadcast %cst_4 : f32 to vector<8x128xf32>
    %24 = arith.divf %23, %22 : vector<8x128xf32>
    %25 = arith.mulf %4, %7 : vector<8x128xf32>
    %26 = arith.mulf %10, %13 : vector<8x128xf32>
    %27 = arith.mulf %4, %10 : vector<8x128xf32>
    %28 = arith.mulf %7, %13 : vector<8x128xf32>
    %29 = arith.mulf %7, %10 : vector<8x128xf32>
    %30 = arith.mulf %4, %13 : vector<8x128xf32>
    %31 = arith.addf %15, %16 : vector<8x128xf32>
    %32 = arith.mulf %24, %31 : vector<8x128xf32>
    %cst_5 = arith.constant 1.000000e+00 : f32
    %33 = vector.broadcast %cst_5 : f32 to vector<8x128xf32>
    %34 = arith.subf %33, %32 : vector<8x128xf32>
    %c0_6 = arith.constant 0 : index
    %35 = arith.index_cast %1 : i32 to index
    %c0_7 = arith.constant 0 : index
    %36 = vector.load %arg2[%c0_6, %35, %c0_7] : memref<9x8x128xf32, #tpu.memory_space<vmem>>, vector<1x8x128xf32>
    %37 = vector.shape_cast %36 : vector<1x8x128xf32> to vector<8x128xf32>
    %38 = vector.shape_cast %34 : vector<8x128xf32> to vector<1x8x128xf32>
    tpu.vector_store %arg2[%c0_6, %35, %c0_7], %38 {strides = array<i32>} : memref<9x8x128xf32, #tpu.memory_space<vmem>>, vector<1x8x128xf32>,
    %39 = arith.subf %25, %26 : vector<8x128xf32>
    %40 = arith.mulf %24, %39 : vector<8x128xf32>
    %c1_8 = arith.constant 1 : index
    %41 = arith.index_cast %1 : i32 to index
    %c0_9 = arith.constant 0 : index
    %42 = vector.load %arg2[%c1_8, %41, %c0_9] : memref<9x8x128xf32, #tpu.memory_space<vmem>>, vector<1x8x128xf32>
    %43 = vector.shape_cast %42 : vector<1x8x128xf32> to vector<8x128xf32>
    %44 = vector.shape_cast %40 : vector<8x128xf32> to vector<1x8x128xf32>
    tpu.vector_store %arg2[%c1_8, %41, %c0_9], %44 {strides = array<i32>} : memref<9x8x128xf32, #tpu.memory_space<vmem>>, vector<1x8x128xf32>,
    %45 = arith.addf %27, %28 : vector<8x128xf32>
    %46 = arith.mulf %24, %45 : vector<8x128xf32>
    %c2_10 = arith.constant 2 : index
    %47 = arith.index_cast %1 : i32 to index
    %c0_11 = arith.constant 0 : index
    %48 = vector.load %arg2[%c2_10, %47, %c0_11] : memref<9x8x128xf32, #tpu.memory_space<vmem>>, vector<1x8x128xf32>
    %49 = vector.shape_cast %48 : vector<1x8x128xf32> to vector<8x128xf32>
    %50 = vector.shape_cast %46 : vector<8x128xf32> to vector<1x8x128xf32>
    tpu.vector_store %arg2[%c2_10, %47, %c0_11], %50 {strides = array<i32>} : memref<9x8x128xf32, #tpu.memory_space<vmem>>, vector<1x8x128xf32>,
    %51 = arith.addf %25, %26 : vector<8x128xf32>
    %52 = arith.mulf %24, %51 : vector<8x128xf32>
    %c3_12 = arith.constant 3 : index
    %53 = arith.index_cast %1 : i32 to index
    %c0_13 = arith.constant 0 : index
    %54 = vector.load %arg2[%c3_12, %53, %c0_13] : memref<9x8x128xf32, #tpu.memory_space<vmem>>, vector<1x8x128xf32>
    %55 = vector.shape_cast %54 : vector<1x8x128xf32> to vector<8x128xf32>
    %56 = vector.shape_cast %52 : vector<8x128xf32> to vector<1x8x128xf32>
    tpu.vector_store %arg2[%c3_12, %53, %c0_13], %56 {strides = array<i32>} : memref<9x8x128xf32, #tpu.memory_space<vmem>>, vector<1x8x128xf32>,
    %57 = arith.addf %14, %16 : vector<8x128xf32>
    %58 = arith.mulf %24, %57 : vector<8x128xf32>
    %cst_14 = arith.constant 1.000000e+00 : f32
    %59 = vector.broadcast %cst_14 : f32 to vector<8x128xf32>
    %60 = arith.subf %59, %58 : vector<8x128xf32>
    %c4 = arith.constant 4 : index
    %61 = arith.index_cast %1 : i32 to index
    %c0_15 = arith.constant 0 : index
    %62 = vector.load %arg2[%c4, %61, %c0_15] : memref<9x8x128xf32, #tpu.memory_space<vmem>>, vector<1x8x128xf32>
    %63 = vector.shape_cast %62 : vector<1x8x128xf32> to vector<8x128xf32>
    %64 = vector.shape_cast %60 : vector<8x128xf32> to vector<1x8x128xf32>
    tpu.vector_store %arg2[%c4, %61, %c0_15], %64 {strides = array<i32>} : memref<9x8x128xf32, #tpu.memory_space<vmem>>, vector<1x8x128xf32>,
    %65 = arith.subf %29, %30 : vector<8x128xf32>
    %66 = arith.mulf %24, %65 : vector<8x128xf32>
    %c5 = arith.constant 5 : index
    %67 = arith.index_cast %1 : i32 to index
    %c0_16 = arith.constant 0 : index
    %68 = vector.load %arg2[%c5, %67, %c0_16] : memref<9x8x128xf32, #tpu.memory_space<vmem>>, vector<1x8x128xf32>
    %69 = vector.shape_cast %68 : vector<1x8x128xf32> to vector<8x128xf32>
    %70 = vector.shape_cast %66 : vector<8x128xf32> to vector<1x8x128xf32>
    tpu.vector_store %arg2[%c5, %67, %c0_16], %70 {strides = array<i32>} : memref<9x8x128xf32, #tpu.memory_space<vmem>>, vector<1x8x128xf32>,
    %71 = arith.subf %27, %28 : vector<8x128xf32>
    %72 = arith.mulf %24, %71 : vector<8x128xf32>
    %c6 = arith.constant 6 : index
    %73 = arith.index_cast %1 : i32 to index
    %c0_17 = arith.constant 0 : index
    %74 = vector.load %arg2[%c6, %73, %c0_17] : memref<9x8x128xf32, #tpu.memory_space<vmem>>, vector<1x8x128xf32>
    %75 = vector.shape_cast %74 : vector<1x8x128xf32> to vector<8x128xf32>
    %76 = vector.shape_cast %72 : vector<8x128xf32> to vector<1x8x128xf32>
    tpu.vector_store %arg2[%c6, %73, %c0_17], %76 {strides = array<i32>} : memref<9x8x128xf32, #tpu.memory_space<vmem>>, vector<1x8x128xf32>,
    %77 = arith.addf %30, %29 : vector<8x128xf32>
    %78 = arith.mulf %24, %77 : vector<8x128xf32>
    %c7 = arith.constant 7 : index
    %79 = arith.index_cast %1 : i32 to index
    %c0_18 = arith.constant 0 : index
    %80 = vector.load %arg2[%c7, %79, %c0_18] : memref<9x8x128xf32, #tpu.memory_space<vmem>>, vector<1x8x128xf32>
    %81 = vector.shape_cast %80 : vector<1x8x128xf32> to vector<8x128xf32>
    %82 = vector.shape_cast %78 : vector<8x128xf32> to vector<1x8x128xf32>
    tpu.vector_store %arg2[%c7, %79, %c0_18], %82 {strides = array<i32>} : memref<9x8x128xf32, #tpu.memory_space<vmem>>, vector<1x8x128xf32>,
    %83 = arith.addf %14, %15 : vector<8x128xf32>
    %84 = arith.mulf %24, %83 : vector<8x128xf32>
    %cst_19 = arith.constant 1.000000e+00 : f32
    %85 = vector.broadcast %cst_19 : f32 to vector<8x128xf32>
    %86 = arith.subf %85, %84 : vector<8x128xf32>
    %c8 = arith.constant 8 : index
    %87 = arith.index_cast %1 : i32 to index
    %c0_20 = arith.constant 0 : index
    %88 = vector.load %arg2[%c8, %87, %c0_20] : memref<9x8x128xf32, #tpu.memory_space<vmem>>, vector<1x8x128xf32>
    %89 = vector.shape_cast %88 : vector<1x8x128xf32> to vector<8x128xf32>
    %90 = vector.shape_cast %86 : vector<8x128xf32> to vector<1x8x128xf32>
    tpu.vector_store %arg2[%c8, %87, %c0_20], %90 {strides = array<i32>} : memref<9x8x128xf32, #tpu.memory_space<vmem>>, vector<1x8x128xf32>,
    %c1_i32 = arith.constant 1 : i32
    return
  }
  func.func @transform_0(%arg0: i32) -> (i32, i32, i32) {
    %c0_i32 = arith.constant 0 : i32
    %c0_i32_0 = arith.constant 0 : i32
    %c0_i32_1 = arith.constant 0 : i32
    return %c0_i32, %arg0, %c0_i32_0 : i32, i32, i32
  }
  func.func @transform_1(%arg0: i32) -> (i32, i32, i32) {
    %c0_i32 = arith.constant 0 : i32
    %c0_i32_0 = arith.constant 0 : i32
    %c0_i32_1 = arith.constant 0 : i32
    return %c0_i32, %arg0, %c0_i32_0 : i32, i32, i32
  }
}

</mosaic_0001>

<bundles_post_ra>
// kernel: quaternion_pallas_native.1
= control target key start
LH: loop header
LB: loop body
LE: loop exit
PB: predicated region body
PF: predicated region fallthrough
CT: control target
= control target key end

     0   :  { %s153_s0 = inlined_call_operand.vmem [shape: f32[4,8,128], index: 0, kind: input, shape index: {}]   ;;  %s154_s1 = inlined_call_operand.vmem [shape: f32[9,8,128], index: 1, kind: output, shape index: {}]  }
   0x1   :  { %v8_v0 = vld [vmem:[%s153_s0] sm:$0xff]  ;;  %v91_v1 = vld [vmem:[%s153_s0 + $0x8] sm:$0xff]  ;;  %v92_v2 = vld [vmem:[%s153_s0 + $0x10] sm:$0xff] }
   0x2   :  { %v93_v3 = vld [vmem:[%s153_s0 + $0x18] sm:$0xff]  ;;  %v18_v4 = vmul.f32 %v8_v0, %v8_v0  ;;  %v19_v5 = vmul.f32 %v91_v1, %v91_v1  ;;  %v20_v6 = vmul.f32 %v92_v2, %v92_v2  ;;  %v28_v12 = vmul.f32 %v91_v1, %v8_v0 }
   0x3   :  { %v21_v7 = vmul.f32 %v93_v3, %v93_v3  ;;  %v29_v13 = vmul.f32 %v93_v3, %v92_v2  ;;  %v30_v14 = vmul.f32 %v92_v2, %v8_v0  ;;  %v31_v15 = vmul.f32 %v93_v3, %v91_v1 }
   0x4   :  { %v22_v8 = vadd.f32 %v19_v5, %v18_v4  ;;  %v32_v16 = vmul.f32 %v92_v2, %v91_v1  ;;  %v33_v17 = vmul.f32 %v93_v3, %v8_v0  ;;  %v34_v18 = vadd.f32 %v20_v6, %v19_v5 }
   0x5   :  { %v38_v19 = vsub.f32 %v28_v12, %v29_v13  ;;  %v42_v20 = vadd.f32 %v31_v15, %v30_v14  ;;  %v46_v21 = vadd.f32 %v29_v13, %v28_v12  ;;  %v50_v23 = vadd.f32 %v20_v6, %v18_v4 }
   0x6   :  { %v23_v9 = vadd.f32 %v22_v8, %v20_v6  ;;  %v56_v24 = vsub.f32 %v32_v16, %v33_v17  ;;  %v61_v25 = vsub.f32 %v30_v14, %v31_v15  ;;  %v66_v26 = vadd.f32 %v33_v17, %v32_v16 }
   0x8   :  { %v24_v10 = vadd.f32 %v23_v9, %v21_v7 }
   0xa   :  { %v25_v11 = vadd.f32 1e-05, %v24_v10 }
   0xc   :  { %102 = vrcp.f32 %v25_v11 }
  0x16   :  { %v103_v22 = vpop.eup %102 }
  0x17   :  { %v27_v27 = vmul.f32 2.0, %v103_v22 }
  0x19   :  { %v35_v28 = vmul.f32 %v34_v18, %v27_v27  ;;  %v39_v29 = vmul.f32 %v38_v19, %v27_v27  ;;  %v43_v30 = vmul.f32 %v42_v20, %v27_v27  ;;  %v47_v31 = vmul.f32 %v46_v21, %v27_v27 }
  0x1a   :  { %v51_v32 = vmul.f32 %v50_v23, %v27_v27  ;;  %v57_v33 = vmul.f32 %v56_v24, %v27_v27  ;;  %v62_v34 = vmul.f32 %v61_v25, %v27_v27  ;;  %v67_v35 = vmul.f32 %v66_v26, %v27_v27 }
  0x1b   :  { %v36_v36 = vsub.f32 1.0, %v35_v28  ;;  %94 = vst [vmem:[%s154_s1 + $0x8] sm:$0xff] %v39_v29  ;;  %95 = vst [vmem:[%s154_s1 + $0x10] sm:$0xff] %v43_v30  ;;  %v71_v37 = vmul.f32 %v27_v27, %v22_v8 }
  0x1c   :  { %96 = vst [vmem:[%s154_s1 + $0x18] sm:$0xff] %v47_v31  ;;  %v52_v38 = vsub.f32 1.0, %v51_v32  ;;  %98 = vst [vmem:[%s154_s1 + $0x28] sm:$0xff] %v57_v33 }
  0x1d   :  { %99 = vst [vmem:[%s154_s1 + $0x30] sm:$0xff] %v62_v34  ;;  %100 = vst [vmem:[%s154_s1 + $0x38] sm:$0xff] %v67_v35  ;;  %v72_v39 = vsub.f32 1.0, %v71_v37 }
  0x1e   :  { %37 = vst [vmem:[%s154_s1] sm:$0xff] %v36_v36  ;;  %97 = vst [vmem:[%s154_s1 + $0x20] sm:$0xff] %v52_v38 }
  0x1f   :  { %101 = vst [vmem:[%s154_s1 + $0x40] sm:$0xff] %v72_v39 }

</bundles_post_ra>
